<compile_context>
chip_gen: v7x
topology: tpu7x:2x2x1
jax: 0.10.0
libtpu: 0.0.40
codegen_flags: <defaults>
</compile_context>

<pallas_src>
import jax
import jax.numpy as jnp
from jax.experimental import pallas as pl
from jax.experimental.pallas import tpu as pltpu

D_MODEL = 256
DFF = 512
LN_EPS = 1e-5


def _round_up(x, m):
    return ((x + m - 1) // m) * m


def ffn_kernel(x_ref, w1_ref, b1_ref, w2_ref, b2_ref, gamma_ref, beta_ref, o_ref):
    # Load the (tm, D_MODEL) token tile exactly once; derive both precisions from it.
    xv = x_ref[...]
    x_f32 = xv if xv.dtype == jnp.float32 else xv.astype(jnp.float32)   # residual path
    x_bf16 = xv if xv.dtype == jnp.bfloat16 else xv.astype(jnp.bfloat16)  # MXU operand

    # Linear1 + ReLU (bf16 x bf16 operands -> f32 MXU accumulation)
    h = jnp.dot(x_bf16, w1_ref[...], preferred_element_type=jnp.float32) + b1_ref[...]
    h = jnp.maximum(h, 0.0)

    # Linear2 (bf16 operands, f32 accumulation)
    y = jnp.dot(h.astype(jnp.bfloat16), w2_ref[...],
                preferred_element_type=jnp.float32) + b2_ref[...]

    # Residual add (Dropout is identity at inference; no RNG applied)
    r = x_f32 + y

    # LayerNorm over d_model (biased variance, matching nn.LayerNorm), all f32.
    # Lane-axis reductions hit the XLU and rsqrt the EUP — hidden under MXU work.
    mean = jnp.mean(r, axis=-1, keepdims=True)
    cen = r - mean
    var = jnp.mean(cen * cen, axis=-1, keepdims=True)
    norm = cen * jax.lax.rsqrt(var + LN_EPS)
    o_ref[...] = (norm * gamma_ref[...] + beta_ref[...]).astype(o_ref.dtype)


def _pick_row_tile(M, tm_max, min_tiles=2, min_balanced_rows=256):
    """Pick the token-row tile:
       * M > tm_max  -> ceil(M/tm_max) (>= min_tiles) balanced, 8-aligned tiles.
       * mid-sized M -> split into >= min_tiles tiles of >= min_balanced_rows rows so
                        v7x's two TensorCores both get work (negligible cost on v5e/v6e).
       * tiny M      -> one sublane-aligned tile (no wasted rows)."""
    M8 = _round_up(max(M, 1), 8)
    if M8 > tm_max:
        n = max(pl.cdiv(M, tm_max), min_tiles)
        return _round_up(pl.cdiv(M, n), 8)
    if M8 >= min_tiles * min_balanced_rows:
        return _round_up(pl.cdiv(M, min_tiles), 8)
    return M8


def ffn_forward(x, w1, b1, w2, b2, gamma, beta, *, tm=512, min_tiles=2):
    """x: (B, S, D_MODEL) float32 or bfloat16. Output matches x.dtype."""
    B, S, D = x.shape
    assert D == D_MODEL
    M = B * S
    x2 = x.reshape(M, D)

    tm = _pick_row_tile(M, tm, min_tiles)
    n_tiles = pl.cdiv(M, tm)  # final partial block: padded reads, masked writes (per-row safe)

    # Cast matmul weights to bf16 once on the host; biases / LN params stay f32.
    w1_bf = w1.astype(jnp.bfloat16)
    w2_bf = w2.astype(jnp.bfloat16)

    # Grid-invariant operands: single-buffered (no point double-buffering constants).
    const_mode = pl.Buffered(1)

    itemsize = jnp.dtype(x.dtype).itemsize
    cost = pl.CostEstimate(
        flops=4 * M * D_MODEL * DFF,                       # two matmuls, 2 FLOP / MAC
        transcendentals=M,                                 # one rsqrt per row (LayerNorm)
        bytes_accessed=(2 * M * D * itemsize               # activations in + out
                        + (w1_bf.size + w2_bf.size) * 2    # bf16 weights
                        + (b1.size + b2.size + gamma.size + beta.size) * 4),
    )

    out = pl.pallas_call(
        ffn_kernel,
        out_shape=jax.ShapeDtypeStruct((M, D), x.dtype),
        grid_spec=pltpu.PrefetchScalarGridSpec(
            num_scalar_prefetch=0,
            grid=(n_tiles,),
            in_specs=[
                pl.BlockSpec((tm, D), lambda i: (i, 0)),                              # x tile
                pl.BlockSpec((D, DFF), lambda i: (0, 0), pipeline_mode=const_mode),   # W1 (bf16)
                pl.BlockSpec((1, DFF), lambda i: (0, 0), pipeline_mode=const_mode),   # b1
                pl.BlockSpec((DFF, D), lambda i: (0, 0), pipeline_mode=const_mode),   # W2 (bf16)
                pl.BlockSpec((1, D), lambda i: (0, 0), pipeline_mode=const_mode),     # b2
                pl.BlockSpec((1, D), lambda i: (0, 0), pipeline_mode=const_mode),     # LN gamma
                pl.BlockSpec((1, D), lambda i: (0, 0), pipeline_mode=const_mode),     # LN beta
            ],
            # Lane-dense 256-wide output block -> unmasked vst (do not split below 128 lanes).
            out_specs=pl.BlockSpec((tm, D), lambda i: (i, 0)),
        ),
        compiler_params=pltpu.CompilerParams(
            dimension_semantics=("parallel",),        # v7x shards the row-tile axis across TCs
            vmem_limit_bytes=32 * 1024 * 1024,        # headroom for tm up to ~1024 on v5e
        ),
        cost_estimate=cost,
    )(x2, w1_bf, b1, w2_bf, b2, gamma, beta)

    return out.reshape(B, S, D)


def ffn_reference_f32(x, w1, b1, w2, b2, gamma, beta):
    h = jnp.maximum(x @ w1 + b1[0], 0.0)
    y = h @ w2 + b2[0]
    r = x + y
    mean = jnp.mean(r, axis=-1, keepdims=True)
    var = jnp.mean((r - mean) ** 2, axis=-1, keepdims=True)
    return (r - mean) / jnp.sqrt(var + LN_EPS) * gamma[0] + beta[0]


def ffn_reference_bf16(x, w1, b1, w2, b2, gamma, beta):
    # Mirrors the kernel's precision choices (bf16 matmul operands, f32 accumulation).
    h = jnp.dot(x.astype(jnp.bfloat16), w1.astype(jnp.bfloat16),
                preferred_element_type=jnp.float32) + b1[0]
    h = jnp.maximum(h, 0.0)
    y = jnp.dot(h.astype(jnp.bfloat16), w2.astype(jnp.bfloat16),
                preferred_element_type=jnp.float32) + b2[0]
    r = x + y
    mean = jnp.mean(r, axis=-1, keepdims=True)
    var = jnp.mean((r - mean) ** 2, axis=-1, keepdims=True)
    return (r - mean) / jnp.sqrt(var + LN_EPS) * gamma[0] + beta[0]


if __name__ == "__main__":
    key = jax.random.PRNGKey(0)
    kx, kw1, kb1, kw2, kb2, kx2 = jax.random.split(key, 6)

    # Deterministic parameters (shapes match nn.Linear / nn.LayerNorm)
    w1 = jax.random.normal(kw1, (D_MODEL, DFF), dtype=jnp.float32) * (1.0 / D_MODEL ** 0.5)
    b1 = jax.random.normal(kb1, (1, DFF), dtype=jnp.float32) * 0.01
    w2 = jax.random.normal(kw2, (DFF, D_MODEL), dtype=jnp.float32) * (1.0 / DFF ** 0.5)
    b2 = jax.random.normal(kb2, (1, D_MODEL), dtype=jnp.float32) * 0.01
    gamma = jnp.ones((1, D_MODEL), dtype=jnp.float32)
    beta = jnp.zeros((1, D_MODEL), dtype=jnp.float32)

    # --- small, divisible case (B=2, S=8) ---
    B, S = 2, 8
    x = jax.random.normal(kx, (B, S, D_MODEL), dtype=jnp.float32)
    out = jax.block_until_ready(ffn_forward(x, w1, b1, w2, b2, gamma, beta))
    ref_f32 = ffn_reference_f32(x, w1, b1, w2, b2, gamma, beta)
    ref_bf16 = ffn_reference_bf16(x, w1, b1, w2, b2, gamma, beta)
    assert out.shape == (B, S, D_MODEL)
    # Tight check vs. an identically-quantized (bf16-operand) reference.
    assert jnp.allclose(out, ref_bf16, atol=2e-3, rtol=2e-3)
    # Loose check vs. the full-f32 reference (bf16 matmul rounding bounds the error).
    assert jnp.allclose(out, ref_f32, atol=5e-2, rtol=5e-2)

    # --- non-divisible row count: exercises the masked partial final block (no host pad) ---
    B2, S2 = 2, 13  # M = 26, not a multiple of 8
    xb = jax.random.normal(kx2, (B2, S2, D_MODEL), dtype=jnp.float32)
    out_b = jax.block_until_ready(ffn_forward(xb, w1, b1, w2, b2, gamma, beta))
    ref_b = ffn_reference_bf16(xb, w1, b1, w2, b2, gamma, beta)
    assert out_b.shape == (B2, S2, D_MODEL)
    assert jnp.allclose(out_b, ref_b, atol=2e-3, rtol=2e-3)

    # --- optional bf16 activation-I/O path (halves HBM traffic on mem-bound v6e/v7x) ---
    x_bf = x.astype(jnp.bfloat16)
    out_bf = jax.block_until_ready(ffn_forward(x_bf, w1, b1, w2, b2, gamma, beta))
    ref_bfio = ffn_reference_bf16(x_bf.astype(jnp.float32), w1, b1, w2, b2, gamma, beta)
    assert out_bf.dtype == jnp.bfloat16 and out_bf.shape == (B, S, D_MODEL)
    assert jnp.allclose(out_bf.astype(jnp.float32), ref_bfio, atol=3e-2, rtol=3e-2)

    # TODO(synk): Dropout(p=0.1) is treated as identity (inference); training-mode RNG not implemented.
    print("KERNEL_OK")
</pallas_src>

<mosaic_0001>
module attributes {stable_mosaic.version = 11 : i64} {
  func.func @ffn_kernel(%arg0: i32, %arg1: memref<16x256xf32, #tpu.memory_space<vmem>>, %arg2: memref<256x512xbf16, #tpu.memory_space<vmem>>, %arg3: memref<1x512xf32, #tpu.memory_space<vmem>>, %arg4: memref<512x256xbf16, #tpu.memory_space<vmem>>, %arg5: memref<1x256xf32, #tpu.memory_space<vmem>>, %arg6: memref<1x256xf32, #tpu.memory_space<vmem>>, %arg7: memref<1x256xf32, #tpu.memory_space<vmem>>, %arg8: memref<16x256xf32, #tpu.memory_space<vmem>>) attributes {dimension_semantics = [#tpu.dimension_semantics<parallel>], iteration_bounds = array<i64: 1>, scalar_prefetch = 0 : i64, scratch_operands = 0 : i64, tpu.core_type = #tpu.core_type<tc>, window_params = [{transform_indices = @transform_0, window_bounds = array<i64: 16, 256>}, {pipeline_mode = #tpu.pipeline_mode<synchronous>, transform_indices = @transform_1, window_bounds = array<i64: 256, 512>}, {pipeline_mode = #tpu.pipeline_mode<synchronous>, transform_indices = @transform_2, window_bounds = array<i64: 1, 512>}, {pipeline_mode = #tpu.pipeline_mode<synchronous>, transform_indices = @transform_3, window_bounds = array<i64: 512, 256>}, {pipeline_mode = #tpu.pipeline_mode<synchronous>, transform_indices = @transform_4, window_bounds = array<i64: 1, 256>}, {pipeline_mode = #tpu.pipeline_mode<synchronous>, transform_indices = @transform_5, window_bounds = array<i64: 1, 256>}, {pipeline_mode = #tpu.pipeline_mode<synchronous>, transform_indices = @transform_6, window_bounds = array<i64: 1, 256>}, {transform_indices = @transform_7, window_bounds = array<i64: 16, 256>}]} {
    %c0 = arith.constant 0 : index
    %c0_0 = arith.constant 0 : index
    %0 = vector.load %arg1[%c0, %c0_0] : memref<16x256xf32, #tpu.memory_space<vmem>>, vector<16x256xf32>
    %1 = arith.truncf %0 : vector<16x256xf32> to vector<16x256xbf16>
    %c0_1 = arith.constant 0 : index
    %c0_2 = arith.constant 0 : index
    %2 = vector.load %arg2[%c0_1, %c0_2] : memref<256x512xbf16, #tpu.memory_space<vmem>>, vector<256x512xbf16>
    %cst = arith.constant dense<0.000000e+00> : vector<16x512xf32>
    %3 = tpu.matmul %1, %2, %cst {dimension_numbers = #tpu.dot_dimension_numbers<[1], [0], [0], [1], [0, 0, 1, 1], [], []>} : vector<16x256xbf16>, vector<256x512xbf16>, vector<16x512xf32> -> vector<16x512xf32>
    %c0_3 = arith.constant 0 : index
    %c0_4 = arith.constant 0 : index
    %4 = vector.load %arg3[%c0_3, %c0_4] : memref<1x512xf32, #tpu.memory_space<vmem>>, vector<1x512xf32>
    %5 = vector.broadcast %4 : vector<1x512xf32> to vector<16x512xf32>
    %6 = arith.addf %3, %5 : vector<16x512xf32>
    %cst_5 = arith.constant 0.000000e+00 : f32
    %7 = vector.broadcast %cst_5 : f32 to vector<16x512xf32>
    %8 = arith.maximumf %6, %7 : vector<16x512xf32>
    %9 = arith.truncf %8 : vector<16x512xf32> to vector<16x512xbf16>
    %c0_6 = arith.constant 0 : index
    %c0_7 = arith.constant 0 : index
    %10 = vector.load %arg4[%c0_6, %c0_7] : memref<512x256xbf16, #tpu.memory_space<vmem>>, vector<512x256xbf16>
    %cst_8 = arith.constant dense<0.000000e+00> : vector<16x256xf32>
    %11 = tpu.matmul %9, %10, %cst_8 {dimension_numbers = #tpu.dot_dimension_numbers<[1], [0], [0], [1], [0, 0, 1, 1], [], []>} : vector<16x512xbf16>, vector<512x256xbf16>, vector<16x256xf32> -> vector<16x256xf32>
    %c0_9 = arith.constant 0 : index
    %c0_10 = arith.constant 0 : index
    %12 = vector.load %arg5[%c0_9, %c0_10] : memref<1x256xf32, #tpu.memory_space<vmem>>, vector<1x256xf32>
    %13 = vector.broadcast %12 : vector<1x256xf32> to vector<16x256xf32>
    %14 = arith.addf %11, %13 : vector<16x256xf32>
    %15 = arith.addf %0, %14 : vector<16x256xf32>
    %cst_11 = arith.constant dense<0.000000e+00> : vector<16xf32>
    %16 = vector.multi_reduction <add>, %15, %cst_11 [1] : vector<16x256xf32> to vector<16xf32>
    %17 = vector.shape_cast %16 : vector<16xf32> to vector<16x1xf32>
    %cst_12 = arith.constant 2.560000e+02 : f32
    %18 = vector.broadcast %cst_12 : f32 to vector<16x1xf32>
    %19 = arith.divf %17, %18 : vector<16x1xf32>
    %20 = vector.broadcast %19 : vector<16x1xf32> to vector<16x256xf32>
    %21 = arith.subf %15, %20 : vector<16x256xf32>
    %22 = arith.mulf %21, %21 : vector<16x256xf32>
    %cst_13 = arith.constant dense<0.000000e+00> : vector<16xf32>
    %23 = vector.multi_reduction <add>, %22, %cst_13 [1] : vector<16x256xf32> to vector<16xf32>
    %24 = vector.shape_cast %23 : vector<16xf32> to vector<16x1xf32>
    %cst_14 = arith.constant 2.560000e+02 : f32
    %25 = vector.broadcast %cst_14 : f32 to vector<16x1xf32>
    %26 = arith.divf %24, %25 : vector<16x1xf32>
    %cst_15 = arith.constant 9.99999974E-6 : f32
    %27 = vector.broadcast %cst_15 : f32 to vector<16x1xf32>
    %28 = arith.addf %26, %27 : vector<16x1xf32>
    %29 = math.rsqrt %28 : vector<16x1xf32>
    %30 = vector.broadcast %29 : vector<16x1xf32> to vector<16x256xf32>
    %31 = arith.mulf %21, %30 : vector<16x256xf32>
    %c0_16 = arith.constant 0 : index
    %c0_17 = arith.constant 0 : index
    %32 = vector.load %arg6[%c0_16, %c0_17] : memref<1x256xf32, #tpu.memory_space<vmem>>, vector<1x256xf32>
    %33 = vector.broadcast %32 : vector<1x256xf32> to vector<16x256xf32>
    %34 = arith.mulf %31, %33 : vector<16x256xf32>
    %c0_18 = arith.constant 0 : index
    %c0_19 = arith.constant 0 : index
    %35 = vector.load %arg7[%c0_18, %c0_19] : memref<1x256xf32, #tpu.memory_space<vmem>>, vector<1x256xf32>
    %36 = vector.broadcast %35 : vector<1x256xf32> to vector<16x256xf32>
    %37 = arith.addf %34, %36 : vector<16x256xf32>
    %c0_20 = arith.constant 0 : index
    %c0_21 = arith.constant 0 : index
    %38 = vector.load %arg8[%c0_20, %c0_21] : memref<16x256xf32, #tpu.memory_space<vmem>>, vector<16x256xf32>
    tpu.vector_store %arg8[%c0_20, %c0_21], %37 {strides = array<i32>} : memref<16x256xf32, #tpu.memory_space<vmem>>, vector<16x256xf32>,
    return
  }
  func.func @transform_0(%arg0: i32) -> (i32, i32) {
    %c0_i32 = arith.constant 0 : i32
    %c0_i32_0 = arith.constant 0 : i32
    return %arg0, %c0_i32 : i32, i32
  }
  func.func @transform_1(%arg0: i32) -> (i32, i32) {
    %c0_i32 = arith.constant 0 : i32
    %c0_i32_0 = arith.constant 0 : i32
    %c0_i32_1 = arith.constant 0 : i32
    return %c0_i32, %c0_i32_0 : i32, i32
  }
  func.func @transform_2(%arg0: i32) -> (i32, i32) {
    %c0_i32 = arith.constant 0 : i32
    %c0_i32_0 = arith.constant 0 : i32
    %c0_i32_1 = arith.constant 0 : i32
    return %c0_i32, %c0_i32_0 : i32, i32
  }
  func.func @transform_3(%arg0: i32) -> (i32, i32) {
    %c0_i32 = arith.constant 0 : i32
    %c0_i32_0 = arith.constant 0 : i32
    %c0_i32_1 = arith.constant 0 : i32
    return %c0_i32, %c0_i32_0 : i32, i32
  }
  func.func @transform_4(%arg0: i32) -> (i32, i32) {
    %c0_i32 = arith.constant 0 : i32
    %c0_i32_0 = arith.constant 0 : i32
    %c0_i32_1 = arith.constant 0 : i32
    return %c0_i32, %c0_i32_0 : i32, i32
  }
  func.func @transform_5(%arg0: i32) -> (i32, i32) {
    %c0_i32 = arith.constant 0 : i32
    %c0_i32_0 = arith.constant 0 : i32
    %c0_i32_1 = arith.constant 0 : i32
    return %c0_i32, %c0_i32_0 : i32, i32
  }
  func.func @transform_6(%arg0: i32) -> (i32, i32) {
    %c0_i32 = arith.constant 0 : i32
    %c0_i32_0 = arith.constant 0 : i32
    %c0_i32_1 = arith.constant 0 : i32
    return %c0_i32, %c0_i32_0 : i32, i32
  }
  func.func @transform_7(%arg0: i32) -> (i32, i32) {
    %c0_i32 = arith.constant 0 : i32
    %c0_i32_0 = arith.constant 0 : i32
    return %arg0, %c0_i32 : i32, i32
  }
}

</mosaic_0001>

<bundles_post_ra>
// kernel: tpu_custom_call.1
= control target key start
LH: loop header
LB: loop body
LE: loop exit
PB: predicated region body
PF: predicated region fallthrough
CT: control target
= control target key end

     0   :  { %12 = vsyncpa [#allocation3], 0  ;;  %s1757_s0 = inlined_call_operand.hbm [shape: f32[16,256], index: 0, kind: input, shape index: {}]   ;;  %s1758_s1 = inlined_call_operand.hbm [shape: bf16[256,512], index: 1, kind: input, shape index: {}]   ;;  %s1759_s2 = inlined_call_operand.vmem [shape: f32[1,512], index: 2, kind: input, shape index: {}]   ;;  %s1760_s3 = inlined_call_operand.hbm [shape: bf16[512,256], index: 3, kind: input, shape index: {}]   ;;  %s1761_s4 = inlined_call_operand.vmem [shape: f32[1,256], index: 4, kind: input, shape index: {}]   ;;  %s1762_s5 = inlined_call_operand.vmem [shape: f32[1,256], index: 5, kind: input, shape index: {}]   ;;  %s1763_s6 = inlined_call_operand.vmem [shape: f32[1,256], index: 6, kind: input, shape index: {}]   ;;  %s1764_s7 = inlined_call_operand.hbm [shape: f32[16,256], index: 7, kind: output, shape index: {}]  }
   0x1   :  { %13 = vsyncpa [#allocation6], 0 }
   0x2   :  { %14 = vsyncpa [#allocation4], 0  ;;  %s1585_s24 = smov [#allocation5]   ;;  %s1586_s26 = smov [#allocation2]  }
   0x3   :  { %s32_s25 = sshll.u32 %s1585_s24, 4  ;;  %s20_s27 = sshll.u32 %s1586_s26, 4  ;;  %s33_s25 = int_to_ptr.vmem [resolvable:$true] %s32_s25  ;;  %s1633_s27 = int_to_ptr.vmem [resolvable:$true] %s20_s27 }
   0x4   :  { %s1491_s30 = scalar_lea.hbm %s1758_s1, 8192 }
   0x5   :  { %p1492_p0 = scmp.ne.s32.totalorder %s1758_s1, %s1491_s30  ;;  %p1495_p1 = scmp.lt.u32.totalorder %s1491_s30, %s1758_s1 }
   0x7   :  { %p1497_p2 = pnand %p1495_p1, %p1492_p0 }
   0x9   :  { %1500 = shalt.err (!%p1497_p2)
}
   0xa   :  { %s1501_s12 = scalar_lea.vmem %s33_s25, 8192  ;;  %p1506_p4 = scmp.lt.s32.totalorder %s33_s25, %s33_s25 }
   0xb   :  { %p1502_p3 = scmp.ne.s32.totalorder %s33_s25, %s1501_s12  ;;  %p1507_p5 = scmp.lt.s32.totalorder %s1501_s12, %s1501_s12 }
   0xd   :  { %p1508_p6 = por %p1507_p5, %p1506_p4 }
   0xf   :  { %p1509_p7 = pnand %p1508_p6, %p1502_p3 }
  0x11   :  { %1512 = shalt.err (!%p1509_p7)
}
  0x12   :  { %s1587_s13 = smov 256   ;;  %s1588_s14 = smov 16  }
  0x13   :  { %38 = dma.hbm_to_vmem [thread:$0]  %s1758_s1, 8192, %s33_s25, [#allocation6], %s1587_s13, %s1587_s13, %s1588_s14  }
  0x14   :  { %s1513_s19 = scalar_lea.hbm %s1757_s0, 512 }
  0x15   :  { %p1514_p8 = scmp.ne.s32.totalorder %s1757_s0, %s1513_s19  ;;  %p1517_p9 = scmp.lt.u32.totalorder %s1513_s19, %s1757_s0 }
  0x17   :  { %p1519_p10 = pnand %p1517_p9, %p1514_p8 }
  0x19   :  { %1522 = shalt.err (!%p1519_p10)
}
  0x1a   :  { %s1523_s24 = scalar_lea.vmem %s1633_s27, 512  ;;  %p1528_p12 = scmp.lt.s32.totalorder %s1633_s27, %s1633_s27 }
  0x1b   :  { %p1524_p11 = scmp.ne.s32.totalorder %s1633_s27, %s1523_s24  ;;  %p1529_p13 = scmp.lt.s32.totalorder %s1523_s24, %s1523_s24 }
  0x1d   :  { %p1530_p0 = por %p1529_p13, %p1528_p12 }
  0x1f   :  { %p1531_p1 = pnand %p1530_p0, %p1524_p11 }
  0x21   :  { %1534 = shalt.err (!%p1531_p1)
}
  0x22   :  { %26 = dma.hbm_to_vmem [thread:$0]  %s1757_s0, 512, %s1633_s27, [#allocation3], %s1587_s13, %s1587_s13, %s1588_s14  }
  0x23   :  { %s1589_s26 = smov [#allocation7]   ;;  %s1535_s8 = scalar_lea.hbm %s1760_s3, 8192 }
  0x24   :  { %s46_s28 = sshll.u32 %s1589_s26, 4  ;;  %p1536_p2 = scmp.ne.s32.totalorder %s1760_s3, %s1535_s8  ;;  %s47_s28 = int_to_ptr.vmem [resolvable:$true] %s46_s28 }
  0x25   :  { %p1539_p3 = scmp.lt.u32.totalorder %s1535_s8, %s1760_s3 }
  0x27   :  { %p1541_p4 = pnand %p1539_p3, %p1536_p2 }
  0x29   :  { %1544 = shalt.err (!%p1541_p4)
}
  0x2a   :  { %s1545_s15 = scalar_lea.vmem %s47_s28, 8192  ;;  %p1550_p6 = scmp.lt.s32.totalorder %s47_s28, %s47_s28 }
  0x2b   :  { %p1546_p5 = scmp.ne.s32.totalorder %s47_s28, %s1545_s15  ;;  %p1551_p7 = scmp.lt.s32.totalorder %s1545_s15, %s1545_s15 }
  0x2d   :  { %p1552_p8 = por %p1551_p7, %p1550_p6 }
  0x2f   :  { %p1553_p9 = pnand %p1552_p8, %p1546_p5 }
  0x31   :  { %1556 = shalt.err (!%p1553_p9)
}
  0x32   :  { %s1590_s0 = smov 128   ;;  %s1591_s27 = smov 8  }
  0x33   :  { %52 = dma.hbm_to_vmem [thread:$0]  %s1760_s3, 8192, %s47_s28, [#allocation6], %s1590_s0, %s1590_s0, %s1591_s27  }
  0x34   :  { %1579 = dma.done.wait [#allocation3], 512  }
  0x35   :  { %1580 = vsyncadd [#allocation3], 4294966784 }
  0x36   :  { %1581 = dma.done.wait [#allocation6], 16384  }
  0x37   :  { %1582 = vsyncadd [#allocation6], 4294950912  ;;  %v1295_v0 = vld [vmem:[#allocation5 + $0x4] ss:$16 sps:$4 sm:$0xff]   ;;  %v1297_v1 = vld [vmem:[#allocation5] ss:$16 sps:$4 sm:$0xff]  }
  0x38   :  { %480 = vmatprep.subr.bf16.mxu1 %v1295_v0  ;;  %v1298_v2 = vld [vmem:[#allocation5 + $0x24] ss:$16 sps:$4 sm:$0xff]   ;;  %v1300_v3 = vld [vmem:[#allocation5 + $0x20] ss:$16 sps:$4 sm:$0xff]   ;;  %v1682_v13 = vld [vmem:[#allocation2 + $0x8] sm:$0xff] }
  0x39   :  { %481 = vmatpush1.bf16.msra.mxu1 %v1297_v1  ;;  %v1301_v4 = vld [vmem:[#allocation5 + $0x44] ss:$16 sps:$4 sm:$0xff]   ;;  %v1303_v5 = vld [vmem:[#allocation5 + $0x40] ss:$16 sps:$4 sm:$0xff]   ;;  %v1684_v14 = vld [vmem:[#allocation2 + $0x18] sm:$0xff] }
  0x3a   :  { %482 = vmatprep.subr.bf16.mxu1 %v1298_v2  ;;  %v1304_v6 = vld [vmem:[#allocation5 + $0x64] ss:$16 sps:$4 sm:$0xff]   ;;  %v1306_v7 = vld [vmem:[#allocation5 + $0x60] ss:$16 sps:$4 sm:$0xff]   ;;  %v1688_v15 = vpack.c.bf16 %v1684_v14, %v1682_v13  ;;  %v1345_v46 = vld [vmem:[#allocation5 + $0xc] ss:$16 sps:$4 sm:$0xff]  }
  0x3b   :  { %v1307_v8 = vld [vmem:[#allocation5 + $0x84] ss:$16 sps:$4 sm:$0xff]   ;;  %v1309_v9 = vld [vmem:[#allocation5 + $0x80] ss:$16 sps:$4 sm:$0xff]   ;;  %v1343_v49 = vld [vmem:[#allocation5 + $0x8] ss:$16 sps:$4 sm:$0xff]  }
  0x3c   :  { %v1310_v10 = vld [vmem:[#allocation5 + $0xa4] ss:$16 sps:$4 sm:$0xff]   ;;  %v1312_v11 = vld [vmem:[#allocation5 + $0xa0] ss:$16 sps:$4 sm:$0xff]   ;;  %512 = vmatprep.mubr.bf16.mxu1 %v1688_v15  ;;  %v1348_v51 = vld [vmem:[#allocation5 + $0x2c] ss:$16 sps:$4 sm:$0xff]  }
  0x3d   :  { %483 = vmatpush1.bf16.msra.mxu1 %v1300_v3  ;;  %v1313_v12 = vld [vmem:[#allocation5 + $0xc4] ss:$16 sps:$4 sm:$0xff]   ;;  %v1315_v16 = vld [vmem:[#allocation5 + $0xc0] ss:$16 sps:$4 sm:$0xff]   ;;  %v1346_v54 = vld [vmem:[#allocation5 + $0x28] ss:$16 sps:$4 sm:$0xff]  }
  0x3e   :  { %484 = vmatprep.subr.bf16.mxu1 %v1301_v4  ;;  %v1316_v17 = vld [vmem:[#allocation5 + $0xe4] ss:$16 sps:$4 sm:$0xff]   ;;  %v1318_v18 = vld [vmem:[#allocation5 + $0xe0] ss:$16 sps:$4 sm:$0xff]   ;;  %v1351_v55 = vld [vmem:[#allocation5 + $0x4c] ss:$16 sps:$4 sm:$0xff]  }
  0x3f   :  { %v1319_v19 = vld [vmem:[#allocation5 + $0x104] ss:$16 sps:$4 sm:$0xff]   ;;  %v1321_v20 = vld [vmem:[#allocation5 + $0x100] ss:$16 sps:$4 sm:$0xff]   ;;  %v1349_v58 = vld [vmem:[#allocation5 + $0x48] ss:$16 sps:$4 sm:$0xff]  }
  0x40   :  { %v1322_v21 = vld [vmem:[#allocation5 + $0x124] ss:$16 sps:$4 sm:$0xff]   ;;  %v1324_v22 = vld [vmem:[#allocation5 + $0x120] ss:$16 sps:$4 sm:$0xff]   ;;  %v1354_v59 = vld [vmem:[#allocation5 + $0x6c] ss:$16 sps:$4 sm:$0xff]  }
  0x41   :  { %485 = vmatpush1.bf16.msra.mxu1 %v1303_v5  ;;  %v1325_v23 = vld [vmem:[#allocation5 + $0x144] ss:$16 sps:$4 sm:$0xff]   ;;  %v1327_v24 = vld [vmem:[#allocation5 + $0x140] ss:$16 sps:$4 sm:$0xff]   ;;  %v1352_v62 = vld [vmem:[#allocation5 + $0x68] ss:$16 sps:$4 sm:$0xff]  }
  0x42   :  { %486 = vmatprep.subr.bf16.mxu1 %v1304_v6  ;;  %v1328_v25 = vld [vmem:[#allocation5 + $0x164] ss:$16 sps:$4 sm:$0xff]   ;;  %v1330_v26 = vld [vmem:[#allocation5 + $0x160] ss:$16 sps:$4 sm:$0xff]   ;;  %v1357_v63 = vld [vmem:[#allocation5 + $0x8c] ss:$16 sps:$4 sm:$0xff]  }
  0x43   :  { %v1331_v27 = vld [vmem:[#allocation5 + $0x184] ss:$16 sps:$4 sm:$0xff]   ;;  %v1393_v29 = vld [vmem:[#allocation7] ss:$8 sps:$4 sm:$0xff]   ;;  %v1396_v33 = vld [vmem:[#allocation7 + $0x10] ss:$8 sps:$4 sm:$0xff]  }
  0x44   :  { %v1391_v28 = vld [vmem:[#allocation7 + $0x4] ss:$8 sps:$4 sm:$0xff]   ;;  %v1333_v30 = vld [vmem:[#allocation5 + $0x180] ss:$16 sps:$4 sm:$0xff]   ;;  %v1394_v31 = vld [vmem:[#allocation7 + $0x14] ss:$8 sps:$4 sm:$0xff]  }
  0x45   :  { %487 = vmatpush1.bf16.msra.mxu1 %v1306_v7  ;;  %974 = vmatprep.subr.bf16.mxu0 %v1391_v28  ;;  %v1334_v32 = vld [vmem:[#allocation5 + $0x1a4] ss:$16 sps:$4 sm:$0xff]   ;;  %v1336_v35 = vld [vmem:[#allocation5 + $0x1a0] ss:$16 sps:$4 sm:$0xff]   ;;  %v1355_v2 = vld [vmem:[#allocation5 + $0x88] ss:$16 sps:$4 sm:$0xff]  }
  0x46   :  { %488 = vmatprep.subr.bf16.mxu1 %v1307_v8  ;;  %975 = vmatpush1.bf16.msra.mxu0 %v1393_v29  ;;  %v1397_v34 = vld [vmem:[#allocation7 + $0x24] ss:$8 sps:$4 sm:$0xff]   ;;  %v1399_v37 = vld [vmem:[#allocation7 + $0x20] ss:$8 sps:$4 sm:$0xff]   ;;  %v1400_v38 = vld [vmem:[#allocation7 + $0x34] ss:$8 sps:$4 sm:$0xff]  }
  0x47   :  { %976 = vmatprep.subr.bf16.mxu0 %v1394_v31  ;;  %v1337_v36 = vld [vmem:[#allocation5 + $0x1c4] ss:$16 sps:$4 sm:$0xff]   ;;  %v1339_v39 = vld [vmem:[#allocation5 + $0x1c0] ss:$16 sps:$4 sm:$0xff]   ;;  %v1360_v3 = vld [vmem:[#allocation5 + $0xac] ss:$16 sps:$4 sm:$0xff]  }
  0x48   :  { %v1340_v40 = vld [vmem:[#allocation5 + $0x1e4] ss:$16 sps:$4 sm:$0xff]   ;;  %v1402_v41 = vld [vmem:[#allocation7 + $0x30] ss:$8 sps:$4 sm:$0xff]   ;;  %v1405_v47 = vld [vmem:[#allocation7 + $0x40] ss:$8 sps:$4 sm:$0xff]  }
  0x49   :  { %489 = vmatpush1.bf16.msra.mxu1 %v1309_v9  ;;  %v1403_v42 = vld [vmem:[#allocation7 + $0x44] ss:$8 sps:$4 sm:$0xff]   ;;  %v1342_v43 = vld [vmem:[#allocation5 + $0x1e0] ss:$16 sps:$4 sm:$0xff]   ;;  %v1406_v48 = vld [vmem:[#allocation7 + $0x54] ss:$8 sps:$4 sm:$0xff]  }
  0x4a   :  { %490 = vmatprep.subr.bf16.mxu1 %v1310_v10  ;;  %977 = vmatpush1.bf16.msra.mxu0 %v1396_v33  ;;  %v1691_v44 = vld [vmem:[#allocation2] sm:$0xff]  ;;  %v1693_v45 = vld [vmem:[#allocation2 + $0x10] sm:$0xff]  ;;  %v1358_v6 = vld [vmem:[#allocation5 + $0xa8] ss:$16 sps:$4 sm:$0xff]  }
  0x4b   :  { %978 = vmatprep.subr.bf16.mxu0 %v1397_v34  ;;  %v1697_v50 = vpack.c.bf16 %v1693_v45, %v1691_v44  ;;  %v1408_v52 = vld [vmem:[#allocation7 + $0x50] ss:$8 sps:$4 sm:$0xff]   ;;  %v1409_v53 = vld [vmem:[#allocation7 + $0x64] ss:$8 sps:$4 sm:$0xff]   ;;  %v1411_v56 = vld [vmem:[#allocation7 + $0x60] ss:$8 sps:$4 sm:$0xff]  }
  0x4c   :  { %v1412_v57 = vld [vmem:[#allocation7 + $0x74] ss:$8 sps:$4 sm:$0xff]   ;;  %v1414_v60 = vld [vmem:[#allocation7 + $0x70] ss:$8 sps:$4 sm:$0xff]   ;;  %v1415_v61 = vld [vmem:[#allocation7 + $0x84] ss:$8 sps:$4 sm:$0xff]  }
  0x4d   :  { %491 = vmatpush1.bf16.msra.mxu1 %v1312_v11  ;;  %v1417_v0 = vld [vmem:[#allocation7 + $0x80] ss:$8 sps:$4 sm:$0xff]   ;;  %v1418_v1 = vld [vmem:[#allocation7 + $0x94] ss:$8 sps:$4 sm:$0xff]   ;;  %v1420_v4 = vld [vmem:[#allocation7 + $0x90] ss:$8 sps:$4 sm:$0xff]  }
  0x4e   :  { %492 = vmatprep.subr.bf16.mxu1 %v1313_v12  ;;  %979 = vmatpush1.bf16.msra.mxu0 %v1399_v37  ;;  %v1421_v5 = vld [vmem:[#allocation7 + $0xa4] ss:$8 sps:$4 sm:$0xff]   ;;  %v1423_v8 = vld [vmem:[#allocation7 + $0xa0] ss:$8 sps:$4 sm:$0xff]   ;;  %v1424_v9 = vld [vmem:[#allocation7 + $0xb4] ss:$8 sps:$4 sm:$0xff]  }
  0x4f   :  { %980 = vmatprep.subr.bf16.mxu0 %v1400_v38  ;;  %v1363_v7 = vld [vmem:[#allocation5 + $0xcc] ss:$16 sps:$4 sm:$0xff]   ;;  %v1361_v10 = vld [vmem:[#allocation5 + $0xc8] ss:$16 sps:$4 sm:$0xff]  }
  0x50   :  { %v1366_v11 = vld [vmem:[#allocation5 + $0xec] ss:$16 sps:$4 sm:$0xff]   ;;  %v1426_v12 = vld [vmem:[#allocation7 + $0xb0] ss:$8 sps:$4 sm:$0xff]   ;;  %v1435_v37 = vld [vmem:[#allocation7 + $0xe0] ss:$8 sps:$4 sm:$0xff]  }
  0x51   :  { %493 = vmatpush1.bf16.msra.mxu1 %v1315_v16  ;;  %v1364_v16 = vld [vmem:[#allocation5 + $0xe8] ss:$16 sps:$4 sm:$0xff]   ;;  %v1384_v29 = vld [vmem:[#allocation5 + $0x1ac] ss:$16 sps:$4 sm:$0xff]  }
  0x52   :  { %494 = vmatprep.subr.bf16.mxu1 %v1316_v17  ;;  %981 = vmatpush1.bf16.msra.mxu0 %v1402_v41  ;;  %v1369_v17 = vld [vmem:[#allocation5 + $0x10c] ss:$16 sps:$4 sm:$0xff]   ;;  %v1379_v28 = vld [vmem:[#allocation5 + $0x188] ss:$16 sps:$4 sm:$0xff]   ;;  %v140_v41 = vlaneseq }
  0x53   :  { %982 = vmatprep.subr.bf16.mxu0 %v1403_v42  ;;  %v1387_v31 = vld [vmem:[#allocation5 + $0x1cc] ss:$16 sps:$4 sm:$0xff]   ;;  %v1388_v34 = vld [vmem:[#allocation5 + $0x1e8] ss:$16 sps:$4 sm:$0xff]  }
  0x54   :  { %v1390_v33 = vld [vmem:[#allocation5 + $0x1ec] ss:$16 sps:$4 sm:$0xff]   ;;  %v1702_v42 = vshrl.u32 %v140_v41, 7 }
  0x55   :  { %495 = vmatpush1.bf16.msra.mxu1 %v1318_v18  ;;  %v1429_v18 = vld [vmem:[#allocation7 + $0xc0] ss:$8 sps:$4 sm:$0xff]   ;;  %v1436_v38 = vld [vmem:[#allocation7 + $0xf4] ss:$8 sps:$4 sm:$0xff]  }
  0x56   :  { %496 = vmatprep.subr.bf16.mxu1 %v1319_v19  ;;  %983 = vmatpush1.bf16.msra.mxu0 %v1405_v47  ;;  %v1430_v19 = vld [vmem:[#allocation7 + $0xd4] ss:$8 sps:$4 sm:$0xff]   ;;  %v1713_v47 = vsub.s32 1, %v1702_v42 }
  0x57   :  { %984 = vmatprep.subr.bf16.mxu0 %v1406_v48 }
  0x59   :  { %497 = vmatpush1.bf16.msra.mxu1 %v1321_v20  ;;  %v1367_v20 = vld [vmem:[#allocation5 + $0x108] ss:$16 sps:$4 sm:$0xff]  }
  0x5a   :  { %498 = vmatprep.subr.bf16.mxu1 %v1322_v21  ;;  %985 = vmatpush1.bf16.msra.mxu0 %v1408_v52  ;;  %v1372_v21 = vld [vmem:[#allocation5 + $0x12c] ss:$16 sps:$4 sm:$0xff]  }
  0x5b   :  { %986 = vmatprep.subr.bf16.mxu0 %v1409_v53 }
  0x5d   :  { %499 = vmatpush1.bf16.msra.mxu1 %v1324_v22  ;;  %v1370_v22 = vld [vmem:[#allocation5 + $0x128] ss:$16 sps:$4 sm:$0xff]  }
  0x5e   :  { %500 = vmatprep.subr.bf16.mxu1 %v1325_v23  ;;  %987 = vmatpush1.bf16.msra.mxu0 %v1411_v56  ;;  %v1375_v23 = vld [vmem:[#allocation5 + $0x14c] ss:$16 sps:$4 sm:$0xff]  }
  0x5f   :  { %988 = vmatprep.subr.bf16.mxu0 %v1412_v57 }
  0x61   :  { %501 = vmatpush1.bf16.msra.mxu1 %v1327_v24  ;;  %v1373_v24 = vld [vmem:[#allocation5 + $0x148] ss:$16 sps:$4 sm:$0xff]  }
  0x62   :  { %502 = vmatprep.subr.bf16.mxu1 %v1328_v25  ;;  %989 = vmatpush1.bf16.msra.mxu0 %v1414_v60  ;;  %v1378_v25 = vld [vmem:[#allocation5 + $0x16c] ss:$16 sps:$4 sm:$0xff]  }
  0x63   :  { %990 = vmatprep.subr.bf16.mxu0 %v1415_v61 }
  0x65   :  { %503 = vmatpush1.bf16.msra.mxu1 %v1330_v26  ;;  %v1376_v26 = vld [vmem:[#allocation5 + $0x168] ss:$16 sps:$4 sm:$0xff]  }
  0x66   :  { %504 = vmatprep.subr.bf16.mxu1 %v1331_v27  ;;  %991 = vmatpush1.bf16.msra.mxu0 %v1417_v0  ;;  %v1381_v27 = vld [vmem:[#allocation5 + $0x18c] ss:$16 sps:$4 sm:$0xff]   ;;  %v1439_v0 = vld [vmem:[#allocation7 + $0x100] ss:$8 sps:$4 sm:$0xff]  }
  0x67   :  { %992 = vmatprep.subr.bf16.mxu0 %v1418_v1  ;;  %v1444_v1 = vld [vmem:[#allocation7 + $0x114] ss:$8 sps:$4 sm:$0xff]  }
  0x69   :  { %505 = vmatpush1.bf16.msra.mxu1 %v1333_v30  ;;  %v1382_v30 = vld [vmem:[#allocation5 + $0x1a8] ss:$16 sps:$4 sm:$0xff]  }
  0x6a   :  { %506 = vmatprep.subr.bf16.mxu1 %v1334_v32  ;;  %993 = vmatpush1.bf16.msra.mxu0 %v1420_v4  ;;  %v1385_v32 = vld [vmem:[#allocation5 + $0x1c8] ss:$16 sps:$4 sm:$0xff]  }
  0x6b   :  { %994 = vmatprep.subr.bf16.mxu0 %v1421_v5  ;;  %v1445_v4 = vld [vmem:[#allocation7 + $0x120] ss:$8 sps:$4 sm:$0xff]   ;;  %v1450_v5 = vld [vmem:[#allocation7 + $0x134] ss:$8 sps:$4 sm:$0xff]  }
  0x6d   :  { %507 = vmatpush1.bf16.msra.mxu1 %v1336_v35  ;;  %v1432_v35 = vld [vmem:[#allocation7 + $0xd0] ss:$8 sps:$4 sm:$0xff]  }
  0x6e   :  { %508 = vmatprep.subr.bf16.mxu1 %v1337_v36  ;;  %995 = vmatpush1.bf16.msra.mxu0 %v1423_v8  ;;  %v1433_v36 = vld [vmem:[#allocation7 + $0xe4] ss:$8 sps:$4 sm:$0xff]   ;;  %v1451_v8 = vld [vmem:[#allocation7 + $0x140] ss:$8 sps:$4 sm:$0xff]  }
  0x6f   :  { %996 = vmatprep.subr.bf16.mxu0 %v1424_v9  ;;  %v1456_v9 = vld [vmem:[#allocation7 + $0x154] ss:$8 sps:$4 sm:$0xff]  }
  0x71   :  { %509 = vmatpush1.bf16.msra.mxu1 %v1339_v39  ;;  %v1438_v39 = vld [vmem:[#allocation7 + $0xf0] ss:$8 sps:$4 sm:$0xff]  }
  0x72   :  { %510 = vmatprep.subr.bf16.mxu1 %v1340_v40  ;;  %997 = vmatpush1.bf16.msra.mxu0 %v1426_v12  ;;  %v1441_v40 = vld [vmem:[#allocation7 + $0x104] ss:$8 sps:$4 sm:$0xff]   ;;  %v1457_v12 = vld [vmem:[#allocation7 + $0x160] ss:$8 sps:$4 sm:$0xff]  }
  0x75   :  { %511 = vmatpush1.bf16.msra.mxu1 %v1342_v43  ;;  %v1705_v43 = vsub.s32 0, %v1702_v42 }
  0x76   :  { %523 = vmatprep.subr.bf16.mxu1 %v1345_v46  ;;  %v1710_v46 = vld [vmem:[%s1759_s2] sm:$0xf] }
  0x77   :  { %v143_v48 = vrot.slane %v1710_v46, %v1705_v43 }
  0x78   :  { %513 = vmatmul.mubr.bf16.vlgmr.msra.gmra.mrb[0].mxu1 %v1697_v50 }
  0x79   :  { %524 = vmatpush1.bf16.msra.mxu1 %v1343_v49  ;;  %555 = vmatprep.mubr.bf16.mxu1 %v1688_v15  ;;  %v1427_v15 = vld [vmem:[#allocation7 + $0xc4] ss:$8 sps:$4 sm:$0xff]   ;;  %v147_v49 = vrot.slane %v1710_v46, %v1713_v47 }
  0x7a   :  { %525 = vmatprep.subr.bf16.mxu1 %v1348_v51  ;;  %998 = vmatprep.subr.bf16.mxu0 %v1427_v15  ;;  %v1462_v15 = vld [vmem:[#allocation7 + $0x174] ss:$8 sps:$4 sm:$0xff]  }
  0x7b   :  { %999 = vmatpush1.bf16.msra.mxu0 %v1429_v18  ;;  %v1463_v18 = vld [vmem:[#allocation7 + $0x180] ss:$8 sps:$4 sm:$0xff]  }
  0x7c   :  { %1000 = vmatprep.subr.bf16.mxu0 %v1430_v19  ;;  %v1468_v19 = vld [vmem:[#allocation7 + $0x194] ss:$8 sps:$4 sm:$0xff]  }
  0x7d   :  { %526 = vmatpush1.bf16.msra.mxu1 %v1346_v54 }
  0x7e   :  { %527 = vmatprep.subr.bf16.mxu1 %v1351_v55 }
  0x7f   :  { %1001 = vmatpush1.bf16.msra.mxu0 %v1432_v35  ;;  %v1481_v35 = vld [vmem:[#allocation7 + $0x1e0] ss:$8 sps:$4 sm:$0xff]  }
  0x80   :  { %1002 = vmatprep.subr.bf16.mxu0 %v1433_v36 }
  0x81   :  { %528 = vmatpush1.bf16.msra.mxu1 %v1349_v58 }
  0x82   :  { %529 = vmatprep.subr.bf16.mxu1 %v1354_v59 }
  0x83   :  { %1003 = vmatpush1.bf16.msra.mxu0 %v1435_v37 }
  0x84   :  { %1004 = vmatprep.subr.bf16.mxu0 %v1436_v38  ;;  %v1486_v38 = vld [vmem:[#allocation7 + $0x1f4] ss:$8 sps:$4 sm:$0xff]  }
  0x85   :  { %530 = vmatpush1.bf16.msra.mxu1 %v1352_v62 }
  0x86   :  { %531 = vmatprep.subr.bf16.mxu1 %v1357_v63 }
  0x87   :  { %1005 = vmatpush1.bf16.msra.mxu0 %v1438_v39 }
  0x88   :  { %1017 = vmatprep.subr.bf16.mxu0 %v1441_v40 }
  0x89   :  { %532 = vmatpush1.bf16.msra.mxu1 %v1355_v2  ;;  %v1442_v2 = vld [vmem:[#allocation7 + $0x110] ss:$8 sps:$4 sm:$0xff]  }
  0x8a   :  { %533 = vmatprep.subr.bf16.mxu1 %v1360_v3  ;;  %v1447_v3 = vld [vmem:[#allocation7 + $0x124] ss:$8 sps:$4 sm:$0xff]  }
  0x8d   :  { %534 = vmatpush1.bf16.msra.mxu1 %v1358_v6  ;;  %v1448_v6 = vld [vmem:[#allocation7 + $0x130] ss:$8 sps:$4 sm:$0xff]  }
  0x8e   :  { %535 = vmatprep.subr.bf16.mxu1 %v1363_v7  ;;  %v1453_v7 = vld [vmem:[#allocation7 + $0x144] ss:$8 sps:$4 sm:$0xff]  }
  0x91   :  { %536 = vmatpush1.bf16.msra.mxu1 %v1361_v10  ;;  %v1454_v10 = vld [vmem:[#allocation7 + $0x150] ss:$8 sps:$4 sm:$0xff]  }
  0x92   :  { %537 = vmatprep.subr.bf16.mxu1 %v1366_v11  ;;  %v1459_v11 = vld [vmem:[#allocation7 + $0x164] ss:$8 sps:$4 sm:$0xff]  }
  0x95   :  { %538 = vmatpush1.bf16.msra.mxu1 %v1364_v16  ;;  %v1460_v16 = vld [vmem:[#allocation7 + $0x170] ss:$8 sps:$4 sm:$0xff]  }
  0x96   :  { %539 = vmatprep.subr.bf16.mxu1 %v1369_v17  ;;  %v1465_v17 = vld [vmem:[#allocation7 + $0x184] ss:$8 sps:$4 sm:$0xff]  }
  0x99   :  { %540 = vmatpush1.bf16.msra.mxu1 %v1367_v20  ;;  %v1466_v20 = vld [vmem:[#allocation7 + $0x190] ss:$8 sps:$4 sm:$0xff]  }
  0x9a   :  { %541 = vmatprep.subr.bf16.mxu1 %v1372_v21  ;;  %v1471_v21 = vld [vmem:[#allocation7 + $0x1a4] ss:$8 sps:$4 sm:$0xff]  }
  0x9d   :  { %542 = vmatpush1.bf16.msra.mxu1 %v1370_v22  ;;  %v1469_v22 = vld [vmem:[#allocation7 + $0x1a0] ss:$8 sps:$4 sm:$0xff]  }
  0x9e   :  { %543 = vmatprep.subr.bf16.mxu1 %v1375_v23  ;;  %v1474_v23 = vld [vmem:[#allocation7 + $0x1b4] ss:$8 sps:$4 sm:$0xff]  }
  0xa1   :  { %544 = vmatpush1.bf16.msra.mxu1 %v1373_v24  ;;  %v1472_v24 = vld [vmem:[#allocation7 + $0x1b0] ss:$8 sps:$4 sm:$0xff]  }
  0xa2   :  { %545 = vmatprep.subr.bf16.mxu1 %v1378_v25  ;;  %v1477_v25 = vld [vmem:[#allocation7 + $0x1c4] ss:$8 sps:$4 sm:$0xff]  }
  0xa5   :  { %546 = vmatpush1.bf16.msra.mxu1 %v1376_v26  ;;  %v1475_v26 = vld [vmem:[#allocation7 + $0x1c0] ss:$8 sps:$4 sm:$0xff]  }
  0xa6   :  { %547 = vmatprep.subr.bf16.mxu1 %v1381_v27  ;;  %v1480_v27 = vld [vmem:[#allocation7 + $0x1d4] ss:$8 sps:$4 sm:$0xff]  }
  0xa9   :  { %548 = vmatpush1.bf16.msra.mxu1 %v1379_v28  ;;  %v150_v28 = vsub.s32 2, %v1702_v42 }
  0xaa   :  { %549 = vmatprep.subr.bf16.mxu1 %v1384_v29  ;;  %v154_v29 = vsub.s32 3, %v1702_v42 }
  0xad   :  { %550 = vmatpush1.bf16.msra.mxu1 %v1382_v30  ;;  %v1478_v30 = vld [vmem:[#allocation7 + $0x1d0] ss:$8 sps:$4 sm:$0xff]  }
  0xae   :  { %551 = vmatprep.subr.bf16.mxu1 %v1387_v31  ;;  %v151_v31 = vrot.slane %v1710_v46, %v150_v28 }
  0xb1   :  { %552 = vmatpush1.bf16.msra.mxu1 %v1385_v32  ;;  %v1483_v32 = vld [vmem:[#allocation7 + $0x1e4] ss:$8 sps:$4 sm:$0xff]  }
  0xb2   :  { %553 = vmatprep.subr.bf16.mxu1 %v1390_v33  ;;  %v155_v33 = vrot.slane %v1710_v46, %v154_v29 }
  0xb5   :  { %554 = vmatpush1.bf16.msra.mxu1 %v1388_v34 }
  0xb8   :  { %556 = vmatmul.mubr.bf16.vlgmr.msra.gmra.mrb[4].mxu1 %v1697_v50 }
 0x14b   :  { %v514_v50 = vpop.f32.mrb[0].mxu1 }
 0x14c   :  { %v515_v51 = vadd.f32 %v514_v50, %v143_v48  ;;  %v516_v52 = vpop.f32.mrb[1].mxu1 }
 0x14d   :  { %v517_v53 = vadd.f32 %v516_v52, %v147_v49  ;;  %v518_v54 = vpop.f32.mrb[2].mxu1 }
 0x14e   :  { %v566_v55 = vmax.f32 %v515_v51, 0.0  ;;  %v519_v56 = vadd.f32 %v518_v54, %v143_v48  ;;  %v520_v57 = vpop.f32.mrb[3].mxu1 }
 0x14f   :  { %v521_v58 = vadd.f32 %v520_v57, %v147_v49  ;;  %v567_v60 = vmax.f32 %v517_v53, 0.0  ;;  %v1484_v49 = vld [vmem:[#allocation7 + $0x1f0] ss:$8 sps:$4 sm:$0xff]  }
 0x150   :  { %v570_v59 = vmax.f32 %v519_v56, 0.0 }
 0x151   :  { %v571_v61 = vmax.f32 %v521_v58, 0.0 }
 0x152   :  { %v574_v62 = vpack.c.bf16 %v570_v59, %v566_v55  ;;  %v642_v55 = vld [vmem:[%s1761_s4] sm:$0x3] }
 0x153   :  { %v575_v63 = vpack.c.bf16 %v571_v61, %v567_v60  ;;  %v647_v56 = vrot.slane %v642_v55, %v1705_v43  ;;  %v651_v57 = vrot.slane %v642_v55, %v1713_v47 }
 0x155   :  { %1006 = vmatprep.mubr.bf16.mxu0 %v575_v63 }
 0x156   :  { %1007 = vmatmul.mubr.bf16.vlgmr.msra.gmra.mrb[0].mxu0 %v574_v62 }
 0x157   :  { %1018 = vmatpush1.bf16.msra.mxu0 %v1439_v0 }
 0x158   :  { %1019 = vmatprep.subr.bf16.mxu0 %v1444_v1 }
 0x15b   :  { %1020 = vmatpush1.bf16.msra.mxu0 %v1442_v2 }
 0x15c   :  { %1021 = vmatprep.subr.bf16.mxu0 %v1447_v3 }
 0x15f   :  { %1022 = vmatpush1.bf16.msra.mxu0 %v1445_v4 }
 0x160   :  { %1023 = vmatprep.subr.bf16.mxu0 %v1450_v5 }
 0x163   :  { %1024 = vmatpush1.bf16.msra.mxu0 %v1448_v6 }
 0x164   :  { %1025 = vmatprep.subr.bf16.mxu0 %v1453_v7 }
 0x167   :  { %1026 = vmatpush1.bf16.msra.mxu0 %v1451_v8 }
 0x168   :  { %1027 = vmatprep.subr.bf16.mxu0 %v1456_v9 }
 0x16b   :  { %1028 = vmatpush1.bf16.msra.mxu0 %v1454_v10 }
 0x16c   :  { %1029 = vmatprep.subr.bf16.mxu0 %v1459_v11 }
 0x16f   :  { %1030 = vmatpush1.bf16.msra.mxu0 %v1457_v12 }
 0x170   :  { %1031 = vmatprep.subr.bf16.mxu0 %v1462_v15 }
 0x173   :  { %1032 = vmatpush1.bf16.msra.mxu0 %v1460_v16 }
 0x174   :  { %1033 = vmatprep.subr.bf16.mxu0 %v1465_v17 }
 0x177   :  { %1034 = vmatpush1.bf16.msra.mxu0 %v1463_v18 }
 0x178   :  { %1035 = vmatprep.subr.bf16.mxu0 %v1468_v19 }
 0x17b   :  { %1036 = vmatpush1.bf16.msra.mxu0 %v1466_v20 }
 0x17c   :  { %1037 = vmatprep.subr.bf16.mxu0 %v1471_v21 }
 0x17f   :  { %1038 = vmatpush1.bf16.msra.mxu0 %v1469_v22 }
 0x180   :  { %1039 = vmatprep.subr.bf16.mxu0 %v1474_v23 }
 0x183   :  { %1040 = vmatpush1.bf16.msra.mxu0 %v1472_v24 }
 0x184   :  { %1041 = vmatprep.subr.bf16.mxu0 %v1477_v25 }
 0x187   :  { %1042 = vmatpush1.bf16.msra.mxu0 %v1475_v26  ;;  %v1097_v26 = vld [vmem:[%s1762_s5] sm:$0x3]  ;;  %s1592_s5 = smov [#allocation8]  }
 0x188   :  { %1043 = vmatprep.subr.bf16.mxu0 %v1480_v27  ;;  %v1113_v27 = vld [vmem:[%s1763_s6] sm:$0x3]  ;;  %v1102_v28 = vrot.slane %v1097_v26, %v1705_v43  ;;  %v1106_v29 = vrot.slane %v1097_v26, %v1713_v47  ;;  %s1138_s6 = sshll.u32 %s1592_s5, 4  ;;  %s1139_s6 = int_to_ptr.vmem [resolvable:$true] %s1138_s6 }
 0x189   :  { %s1557_s23 = scalar_lea.vmem %s1139_s6, 512  ;;  %p1562_p11 = scmp.lt.s32.totalorder %s1139_s6, %s1139_s6 }
 0x18a   :  { %p1558_p10 = scmp.ne.s32.totalorder %s1139_s6, %s1557_s23  ;;  %p1563_p12 = scmp.lt.s32.totalorder %s1557_s23, %s1557_s23 }
 0x18b   :  { %v557_v34 = vpop.f32.mrb[4].mxu1  ;;  %1044 = vmatpush1.bf16.msra.mxu0 %v1478_v30 }
 0x18c   :  { %v558_v36 = vadd.f32 %v557_v34, %v151_v31  ;;  %v559_v37 = vpop.f32.mrb[5].mxu1  ;;  %1045 = vmatprep.subr.bf16.mxu0 %v1483_v32  ;;  %v1122_v34 = vrot.slane %v1113_v27, %v1713_v47  ;;  %p1564_p13 = por %p1563_p12, %p1562_p11 }
 0x18d   :  { %v560_v39 = vadd.f32 %v559_v37, %v155_v33  ;;  %v561_v40 = vpop.f32.mrb[6].mxu1 }
 0x18e   :  { %v562_v41 = vadd.f32 %v561_v40, %v151_v31  ;;  %v563_v48 = vpop.f32.mrb[7].mxu1  ;;  %v568_v50 = vmax.f32 %v558_v36, 0.0  ;;  %p1565_p0 = pnand %p1564_p13, %p1558_p10 }
 0x18f   :  { %v564_v42 = vadd.f32 %v563_v48, %v155_v33  ;;  %1046 = vmatpush1.bf16.msra.mxu0 %v1481_v35  ;;  %v569_v52 = vmax.f32 %v560_v39, 0.0  ;;  %v1118_v33 = vrot.slane %v1113_v27, %v1705_v43 }
 0x190   :  { %v572_v51 = vmax.f32 %v562_v41, 0.0  ;;  %1047 = vmatprep.subr.bf16.mxu0 %v1486_v38 }
 0x191   :  { %v573_v53 = vmax.f32 %v564_v42, 0.0 }
 0x192   :  { %v576_v46 = vpack.c.bf16 %v572_v51, %v568_v50 }
 0x193   :  { %v577_v54 = vpack.c.bf16 %v573_v53, %v569_v52  ;;  %1048 = vmatpush1.bf16.msra.mxu0 %v1484_v49 }
 0x195   :  { %1049 = vmatprep.mubr.bf16.mxu0 %v577_v54 }
 0x196   :  { %1050 = vmatmul.mubr.bf16.vlgmr.msra.gmra.mrb[0].mxu0 %v576_v46 }
 0x269   :  { %v1051_v58 = vpop.f32.mrb[0].mxu0 }
 0x26a   :  { %v1279_v59 = vadd.f32 %v1051_v58, %v647_v56  ;;  %v1053_v60 = vpop.f32.mrb[1].mxu0 }
 0x26b   :  { %v1280_v61 = vadd.f32 %v1053_v60, %v651_v57  ;;  %v1055_v62 = vpop.f32.mrb[2].mxu0 }
 0x26c   :  { %v1281_v63 = vadd.f32 %v1055_v62, %v647_v56  ;;  %v1057_v0 = vpop.f32.mrb[3].mxu0  ;;  %v1060_v1 = vadd.f32 %v1279_v59, %v1691_v44 }
 0x26d   :  { %v1282_v2 = vadd.f32 %v1057_v0, %v651_v57  ;;  %v1061_v3 = vadd.f32 %v1280_v61, %v1682_v13 }
 0x26e   :  { %v1062_v4 = vadd.f32 %v1281_v63, %v1693_v45 }
 0x26f   :  { %v1063_v5 = vadd.f32 %v1282_v2, %v1684_v14  ;;  %v1064_v6 = vadd.f32 %v1061_v3, %v1060_v1 }
 0x271   :  { %1065 = vadd.xlane.f32.xlu0 %v1064_v6  ;;  %v1067_v7 = vadd.f32 %v1063_v5, %v1062_v4 }
 0x275   :  { %1068 = vadd.xlane.f32.xlu0 %v1067_v7 }
 0x2fe   :  { %v1066_v8 = vpop.xlane.xlu0 %1065 }
 0x2ff   :  { %v1071_v9 = vmul.f32 0.00390625, %v1066_v8 }
 0x301   :  { %v1073_v10 = vsub.f32 %v1060_v1, %v1071_v9  ;;  %v1074_v11 = vsub.f32 %v1061_v3, %v1071_v9 }
 0x302   :  { %v1069_v12 = vpop.xlane.xlu0 %1068 }
 0x303   :  { %v1072_v15 = vmul.f32 0.00390625, %v1069_v12  ;;  %v1077_v16 = vmul.f32 %v1073_v10, %v1073_v10  ;;  %v1078_v17 = vmul.f32 %v1074_v11, %v1074_v11 }
 0x305   :  { %v1075_v44 = vsub.f32 %v1062_v4, %v1072_v15  ;;  %v1076_v18 = vsub.f32 %v1063_v5, %v1072_v15  ;;  %v1081_v19 = vadd.f32 %v1078_v17, %v1077_v16 }
 0x307   :  { %1082 = vadd.xlane.f32.xlu1 %v1081_v19  ;;  %v1079_v13 = vmul.f32 %v1075_v44, %v1075_v44  ;;  %v1080_v45 = vmul.f32 %v1076_v18, %v1076_v18 }
 0x309   :  { %v1084_v20 = vadd.f32 %v1080_v45, %v1079_v13 }
 0x30b   :  { %1085 = vadd.xlane.f32.xlu1 %v1084_v20 }
 0x394   :  { %v1083_v14 = vpop.xlane.xlu1 %1082 }
 0x395   :  { %v1087_v21 = vmul.f32 0.00390625, %v1083_v14 }
 0x397   :  { %v1089_v22 = vadd.f32 1e-05, %v1087_v21 }
 0x398   :  { %v1086_v23 = vpop.xlane.xlu1 %1085 }
 0x399   :  { %1487 = vrsqrt.f32 %v1089_v22  ;;  %v1088_v24 = vmul.f32 0.00390625, %v1086_v23 }
 0x39b   :  { %v1090_v25 = vadd.f32 1e-05, %v1088_v24 }
 0x39d   :  { %1489 = vrsqrt.f32 %v1090_v25 }
 0x3a3   :  { %v1488_v30 = vpop.eup %1487 }
 0x3a4   :  { %v1093_v31 = vmul.f32 %v1488_v30, %v1073_v10  ;;  %v1094_v32 = vmul.f32 %v1488_v30, %v1074_v11 }
 0x3a6   :  { %v1109_v35 = vmul.f32 %v1102_v28, %v1093_v31  ;;  %v1110_v36 = vmul.f32 %v1106_v29, %v1094_v32 }
 0x3a7   :  { %v1490_v37 = vpop.eup %1489 }
 0x3a8   :  { %v1095_v38 = vmul.f32 %v1490_v37, %v1075_v44  ;;  %v1096_v39 = vmul.f32 %v1490_v37, %v1076_v18  ;;  %v1125_v40 = vadd.f32 %v1118_v33, %v1109_v35  ;;  %v1126_v41 = vadd.f32 %v1122_v34, %v1110_v36 }
 0x3aa   :  { %v1111_v48 = vmul.f32 %v1102_v28, %v1095_v38  ;;  %v1112_v42 = vmul.f32 %v1106_v29, %v1096_v39  ;;  %1129 = vst [vmem:[#allocation8] sm:$0xff] %v1125_v40  ;;  %1130 = vst [vmem:[#allocation8 + $0x8] sm:$0xff] %v1126_v41 }
 0x3ac   :  { %v1127_v49 = vadd.f32 %v1118_v33, %v1111_v48  ;;  %v1128_v50 = vadd.f32 %v1122_v34, %v1112_v42 }
 0x3ae   :  { %1131 = vst [vmem:[#allocation8 + $0x10] sm:$0xff] %v1127_v49  ;;  %1132 = vst [vmem:[#allocation8 + $0x18] sm:$0xff] %v1128_v50 }
 0x3af   :  { %1568 = shalt.err (!%p1565_p0)
}
 0x3b0   :  { %s1569_s25 = scalar_lea.hbm %s1764_s7, 512 }
 0x3b1   :  { %p1570_p1 = scmp.ne.s32.totalorder %s1764_s7, %s1569_s25  ;;  %p1573_p2 = scmp.lt.u32.totalorder %s1569_s25, %s1764_s7 }
 0x3b3   :  { %p1575_p3 = pnand %p1573_p2, %p1570_p1 }
 0x3b5   :  { %1578 = shalt.err (!%p1575_p3)
}
 0x3b6   :  { %1144 = dma.vmem_to_hbm [thread:$0]  %s1139_s6, 512, %s1764_s7, [#allocation4], %s1587_s13, %s1587_s13, %s1588_s14  }
 0x3b7   :  { %1583 = dma.done.wait [#allocation4], 512  }
 0x3b8   :  { %1584 = vsyncadd [#allocation4], 4294966784 }
 0x3b9   :  { %1148 = vsyncpa [#allocation3], 1 }
 0x3ba   :  { %1149 = vsyncpa [#allocation6], 1 }
 0x3bb   :  { %1150 = vsyncpa [#allocation4], 1 }

</bundles_post_ra>
